<compile_context>
chip_gen: v5e
topology: v5e:2x2
jax: 0.10.0
libtpu: 0.0.40
codegen_flags: <defaults>
</compile_context>

<pallas_src>
import math

import jax
import jax.numpy as jnp
from jax.experimental import pallas as pl
from jax.experimental.pallas import tpu as pltpu


_INV_SQRT2 = 0.7071067811865476


def _erf(z):
    # Abramowitz & Stegun 7.1.26 polynomial approximation of erf
    # (max abs error ~1.5e-7), built only from ops that lower cleanly on the
    # TPU VPU/EUP (abs, mul/add, exp, rcp, select).  The divide is done with
    # the EUP approximate reciprocal + one Newton-Raphson refinement step.
    a1, a2, a3, a4, a5 = (0.254829592, -0.284496736, 1.421413741,
                          -1.453152027, 1.061405429)
    p = 0.3275911
    x = jnp.abs(z)
    d = 1.0 + p * x
    t = pl.reciprocal(d, approx=True)
    t = t * (2.0 - d * t)                      # Newton step -> ~f32 accuracy
    poly = ((((a5 * t + a4) * t + a3) * t + a2) * t + a1) * t
    e = 1.0 - poly * jnp.exp(-x * x)
    return jnp.where(z < 0, -e, e)


def _gelu_exact(x):
    # PyTorch nn.GELU() default (approximate='none'): 0.5*x*(1 + erf(x/sqrt(2)))
    return 0.5 * x * (1.0 + _erf(x * _INV_SQRT2))


def tp_mlp_kernel(x_ref, w1_ref, b1_ref, w2_ref, b2_ref, o_ref, acc_ref):
    # grid = (token tiles [parallel], FFN tiles [arbitrary / reduction])
    j = pl.program_id(1)

    @pl.when(j == 0)
    def _():
        acc_ref[...] = jnp.zeros_like(acc_ref)

    # fc1 column-slice: (tm, H) @ (H, tf) -> (tm, tf), bias add, exact GELU.
    # Matmul inputs may be bf16; accumulation and all elementwise math is f32
    # (also keeps v5e, which lacks bf16 VPU/EUP, on the fast path).
    y = jnp.dot(x_ref[...], w1_ref[...],
                preferred_element_type=jnp.float32) + b1_ref[...]
    y = _gelu_exact(y)

    # fc2 partial product accumulated in f32 VMEM scratch: (tm, tf) @ (tf, H).
    acc_ref[...] += jnp.dot(y.astype(w2_ref.dtype), w2_ref[...],
                            preferred_element_type=jnp.float32)

    @pl.when(j == pl.num_programs(1) - 1)
    def _():
        o_ref[...] = (acc_ref[...] + b2_ref[...]).astype(o_ref.dtype)


# ----------------------------------------------------------------------------
# Tile selection (VMEM-budget aware, generation-safe).
# ----------------------------------------------------------------------------

def _vmem_budget_bytes():
    """~70% of physical VMEM; conservative 64 MiB (v7x) fallback."""
    cap = None
    try:
        info = pltpu.get_tpu_info()
        cap = getattr(info, "vmem_capacity_bytes", None)
    except Exception:
        cap = None
    if not cap:
        cap = 64 << 20
    return int(cap * 0.70), int(cap)


def _largest_divisor(total, cap, align):
    """Largest multiple of `align` that divides `total` and is <= cap."""
    t = min(total, cap)
    t = (t // align) * align
    while t >= align:
        if total % t == 0:
            return t
        t -= align
    return None


def _pick_tm(M):
    # Prefer MXU-friendly 256/512 multiples, cap 512 (amortizes grid-step
    # overhead and cuts weight re-streaming), fall back to 128 / 8 multiples.
    tm = None
    for align in (256, 128, 8):
        tm = _largest_divisor(M, 512, align)
        if tm is not None:
            break
    if tm is None:
        tm = M
    # v7x megacore: keep >= 2 token tiles on the "parallel" axis when possible.
    if M // tm < 2 and M % 2 == 0 and (M // 2) % 8 == 0:
        tm = M // 2
    return tm


def _footprint_bytes(tm, tf, H, in_bytes, w_bytes, out_bytes):
    # double-buffered inputs/outputs + f32 accumulator scratch
    dbl = 2 * (tm * H * in_bytes            # x tile
               + H * tf * w_bytes           # W1 column slice
               + tf * 4 + H * 4             # biases (f32)
               + tf * H * w_bytes           # W2 row slice
               + tm * H * out_bytes)        # out tile
    return dbl + tm * H * 4                 # f32 acc scratch


def _choose_tiles(M, H, F, in_bytes, w_bytes, out_bytes, budget):
    tm = _pick_tm(M)
    tf = None
    for align in (256, 128):                # 256-multiples first (v6e/v7x MXU)
        cand = _largest_divisor(F, 1024, align)
        while cand is not None and _footprint_bytes(
                tm, cand, H, in_bytes, w_bytes, out_bytes) > budget:
            cand = _largest_divisor(F, cand - align, align)
        if cand is not None:
            tf = cand
            break
    if tf is None:
        tf = F                               # small / awkward F: full extent
    # If the (tm, H)-resident buffers still blow the budget (v7x, huge H),
    # shrink tm while keeping it a valid multiple of 8 that divides M.
    while (_footprint_bytes(tm, tf, H, in_bytes, w_bytes, out_bytes) > budget
           and tm % 16 == 0 and M % (tm // 2) == 0):
        tm //= 2
    return tm, tf


# ----------------------------------------------------------------------------
# Wrapper
# ----------------------------------------------------------------------------

def prepare_params(params, compute_dtype=jnp.bfloat16):
    """One-time glue (hoisted out of the hot path): transpose PyTorch
    (out, in) weights to (in, out) layout and cast matmul inputs."""
    return {
        "w1": jnp.asarray(params["w1"].T, dtype=compute_dtype),   # (H, F)
        "w2": jnp.asarray(params["w2"].T, dtype=compute_dtype),   # (F, H)
        "b1": jnp.asarray(params["b1"], dtype=jnp.float32)[None, :],   # (1, F)
        "b2": jnp.asarray(params["b2"], dtype=jnp.float32)[None, :],   # (1, H)
    }


def tp_mlp(x, prep, *, tm=None, tf=None):
    """TPMLP forward (tp_world_size == 1, dropout_p == 0.0).

    x: (B, S, H); prep: output of prepare_params() (pre-transposed weights).
    """
    B, S, H = x.shape
    F = prep["w1"].shape[1]
    M = B * S

    compute_dtype = prep["w1"].dtype
    out_dtype = x.dtype
    in_bytes = jnp.dtype(compute_dtype).itemsize
    w_bytes = in_bytes
    out_bytes = jnp.dtype(out_dtype).itemsize

    budget, vmem_cap = _vmem_budget_bytes()
    if tm is None or tf is None:
        a_tm, a_tf = _choose_tiles(M, H, F, in_bytes, w_bytes, out_bytes, budget)
        tm = a_tm if tm is None else tm
        tf = a_tf if tf is None else tf
    assert M % tm == 0 and F % tf == 0, "tile sizes must divide (B*S, ffn)"

    x2 = x.reshape(M, H).astype(compute_dtype)
    grid = (M // tm, F // tf)

    # Scoped VMEM limit sized from the actual tile footprint (+25% headroom),
    # clamped to >= 32 MiB and <= ~90% of physical VMEM.
    fp = _footprint_bytes(tm, tf, H, in_bytes, w_bytes, out_bytes)
    vmem_limit = int(min(max(32 << 20, fp + fp // 4), int(vmem_cap * 0.9)))

    # Bytes include weight re-streaming: W1/W2/b1 are re-read per token tile.
    n_token_tiles = M // tm
    cost = pl.CostEstimate(
        flops=4 * M * H * F,                           # two matmuls
        transcendentals=2 * M * F,                     # exp + rcp in GELU
        bytes_accessed=(M * H * in_bytes               # x read
                        + M * H * out_bytes            # out write
                        + n_token_tiles * (2 * H * F * w_bytes + 4 * F + 4 * H)),
    )

    out2 = pl.pallas_call(
        tp_mlp_kernel,
        out_shape=jax.ShapeDtypeStruct((M, H), out_dtype),
        grid=grid,
        in_specs=[
            pl.BlockSpec((tm, H), lambda i, j: (i, 0)),   # x token tile
            pl.BlockSpec((H, tf), lambda i, j: (0, j)),   # W1 column slice
            pl.BlockSpec((1, tf), lambda i, j: (0, j)),   # b1 slice (f32)
            pl.BlockSpec((tf, H), lambda i, j: (j, 0)),   # W2 row slice
            pl.BlockSpec((1, H), lambda i, j: (0, 0)),    # b2 (constant, f32)
        ],
        out_specs=pl.BlockSpec((tm, H), lambda i, j: (i, 0)),
        scratch_shapes=[pltpu.VMEM((tm, H), jnp.float32)],
        compiler_params=pltpu.CompilerParams(
            dimension_semantics=("parallel", "arbitrary"),
            vmem_limit_bytes=vmem_limit),
        cost_estimate=cost,
    )(x2, prep["w1"], prep["b1"], prep["w2"], prep["b2"])

    return out2.reshape(B, S, H)


# ----------------------------------------------------------------------------
# Reference + init + test harness
# ----------------------------------------------------------------------------

def tp_mlp_reference(x, params):
    """Pure-JAX reference mirroring the PyTorch forward (world_size=1)."""
    def lin(inp, w, b):
        return inp @ w.T + b
    y = jax.nn.gelu(lin(x, params["w1"], params["b1"]), approximate=False)
    return lin(y, params["w2"], params["b2"])


def init_params(key, hidden_size, ffn_hidden_size):
    """Deterministic nn.Linear-style init (uniform in +-1/sqrt(fan_in)),
    PyTorch (out_features, in_features) layout."""
    H, F = hidden_size, ffn_hidden_size
    k1, k2, k3, k4 = jax.random.split(key, 4)
    b1_bound = 1.0 / math.sqrt(H)   # fc1: Linear(H, F)
    b2_bound = 1.0 / math.sqrt(F)   # fc2: Linear(F, H)
    u = lambda k, shape, b: jax.random.uniform(k, shape, jnp.float32, -b, b)
    return {
        "w1": u(k1, (F, H), b1_bound), "b1": u(k2, (F,), b1_bound),
        "w2": u(k3, (H, F), b2_bound), "b2": u(k4, (H,), b2_bound),
    }


if __name__ == "__main__":
    # Small, lane-dense shapes (H % 128 == 0).  NOTE: for benchmarking use
    # production-scale M/H/F with the default tile selection, not these.
    B, S, H, FFN = 2, 8, 256, 512

    key = jax.random.PRNGKey(0)
    kx, kp = jax.random.split(key)
    x = jax.random.normal(kx, (B, S, H), dtype=jnp.float32)
    params = init_params(kp, H, FFN)
    ref = tp_mlp_reference(x, params)

    # 1) f32 compute path, small explicit tiles so both grid axes (parallel
    #    token tiles + FFN reduction with the f32 accumulator) are exercised.
    prep_f32 = prepare_params(params, compute_dtype=jnp.float32)
    out_f32 = jax.block_until_ready(tp_mlp(x, prep_f32, tm=8, tf=256))
    assert out_f32.shape == (B, S, H)
    err_f32 = float(jnp.max(jnp.abs(out_f32 - ref)))
    assert jnp.allclose(out_f32, ref, atol=1e-4, rtol=1e-4), err_f32

    # 2) production-style bf16 compute path (MXU-friendly, half the weight
    #    DMA/VMEM), automatic tile selection; looser tolerance (bf16 inputs).
    prep_bf16 = prepare_params(params, compute_dtype=jnp.bfloat16)
    out_bf16 = jax.block_until_ready(tp_mlp(x, prep_bf16))
    err_bf16 = float(jnp.max(jnp.abs(out_bf16 - ref)))
    assert jnp.allclose(out_bf16, ref, atol=5e-2, rtol=5e-2), err_bf16

    print("KERNEL_OK")
</pallas_src>

<mosaic_0001>
module attributes {stable_mosaic.version = 11 : i64} {
  func.func @tp_mlp_kernel(%arg0: i32, %arg1: i32, %arg2: memref<8x256xf32, #tpu.memory_space<vmem>>, %arg3: memref<256x256xf32, #tpu.memory_space<vmem>>, %arg4: memref<1x256xf32, #tpu.memory_space<vmem>>, %arg5: memref<256x256xf32, #tpu.memory_space<vmem>>, %arg6: memref<1x256xf32, #tpu.memory_space<vmem>>, %arg7: memref<8x256xf32, #tpu.memory_space<vmem>>, %arg8: memref<8x256xf32, #tpu.memory_space<vmem>>) attributes {dimension_semantics = [#tpu.dimension_semantics<parallel>, #tpu.dimension_semantics<arbitrary>], iteration_bounds = array<i64: 2, 2>, scalar_prefetch = 0 : i64, scratch_operands = 1 : i64, tpu.core_type = #tpu.core_type<tc>, window_params = [{transform_indices = @transform_0, window_bounds = array<i64: 8, 256>}, {transform_indices = @transform_1, window_bounds = array<i64: 256, 256>}, {transform_indices = @transform_2, window_bounds = array<i64: 1, 256>}, {transform_indices = @transform_3, window_bounds = array<i64: 256, 256>}, {pipeline_mode = #tpu.pipeline_mode<synchronous>, transform_indices = @transform_4, window_bounds = array<i64: 1, 256>}, {transform_indices = @transform_5, window_bounds = array<i64: 8, 256>}]} {
    %c0_i32 = arith.constant 0 : i32
    %0 = arith.cmpi eq, %arg1, %c0_i32 : i32
    %1 = arith.extui %0 : i1 to i32
    %c0_i32_0 = arith.constant 0 : i32
    %2 = arith.cmpi ne, %1, %c0_i32_0 : i32
    scf.if %2 {
      %cst_29 = arith.constant 0.000000e+00 : f32
      %60 = vector.broadcast %cst_29 : f32 to vector<8x256xf32>
      %c0_30 = arith.constant 0 : index
      %c0_31 = arith.constant 0 : index
      %61 = vector.load %arg8[%c0_30, %c0_31] : memref<8x256xf32, #tpu.memory_space<vmem>>, vector<8x256xf32>
      tpu.vector_store %arg8[%c0_30, %c0_31], %60 {strides = array<i32>} : memref<8x256xf32, #tpu.memory_space<vmem>>, vector<8x256xf32>,
    } else {
    }
    %c0 = arith.constant 0 : index
    %c0_1 = arith.constant 0 : index
    %3 = vector.load %arg2[%c0, %c0_1] : memref<8x256xf32, #tpu.memory_space<vmem>>, vector<8x256xf32>
    %c0_2 = arith.constant 0 : index
    %c0_3 = arith.constant 0 : index
    %4 = vector.load %arg3[%c0_2, %c0_3] : memref<256x256xf32, #tpu.memory_space<vmem>>, vector<256x256xf32>
    %cst = arith.constant dense<0.000000e+00> : vector<8x256xf32>
    %5 = tpu.matmul %3, %4, %cst {dimension_numbers = #tpu.dot_dimension_numbers<[1], [0], [0], [1], [0, 0, 1, 1], [], []>} : vector<8x256xf32>, vector<256x256xf32>, vector<8x256xf32> -> vector<8x256xf32>
    %c0_4 = arith.constant 0 : index
    %c0_5 = arith.constant 0 : index
    %6 = vector.load %arg4[%c0_4, %c0_5] : memref<1x256xf32, #tpu.memory_space<vmem>>, vector<1x256xf32>
    %7 = vector.broadcast %6 : vector<1x256xf32> to vector<8x256xf32>
    %8 = arith.addf %5, %7 : vector<8x256xf32>
    %cst_6 = arith.constant 5.000000e-01 : f32
    %9 = vector.broadcast %cst_6 : f32 to vector<8x256xf32>
    %10 = arith.mulf %9, %8 : vector<8x256xf32>
    %cst_7 = arith.constant 0.707106769 : f32
    %11 = vector.broadcast %cst_7 : f32 to vector<8x256xf32>
    %12 = arith.mulf %8, %11 : vector<8x256xf32>
    %13 = math.absf %12 : vector<8x256xf32>
    %cst_8 = arith.constant 0.327591091 : f32
    %14 = vector.broadcast %cst_8 : f32 to vector<8x256xf32>
    %15 = arith.mulf %14, %13 : vector<8x256xf32>
    %cst_9 = arith.constant 1.000000e+00 : f32
    %16 = vector.broadcast %cst_9 : f32 to vector<8x256xf32>
    %17 = arith.addf %16, %15 : vector<8x256xf32>
    %18 = tpu.reciprocal %17 {approx = true} : vector<8x256xf32> -> vector<8x256xf32>
    %19 = arith.mulf %17, %18 : vector<8x256xf32>
    %cst_10 = arith.constant 2.000000e+00 : f32
    %20 = vector.broadcast %cst_10 : f32 to vector<8x256xf32>
    %21 = arith.subf %20, %19 : vector<8x256xf32>
    %22 = arith.mulf %18, %21 : vector<8x256xf32>
    %cst_11 = arith.constant 1.06140542 : f32
    %23 = vector.broadcast %cst_11 : f32 to vector<8x256xf32>
    %24 = arith.mulf %23, %22 : vector<8x256xf32>
    %cst_12 = arith.constant -1.45315206 : f32
    %25 = vector.broadcast %cst_12 : f32 to vector<8x256xf32>
    %26 = arith.addf %24, %25 : vector<8x256xf32>
    %27 = arith.mulf %26, %22 : vector<8x256xf32>
    %cst_13 = arith.constant 1.42141378 : f32
    %28 = vector.broadcast %cst_13 : f32 to vector<8x256xf32>
    %29 = arith.addf %27, %28 : vector<8x256xf32>
    %30 = arith.mulf %29, %22 : vector<8x256xf32>
    %cst_14 = arith.constant -0.284496725 : f32
    %31 = vector.broadcast %cst_14 : f32 to vector<8x256xf32>
    %32 = arith.addf %30, %31 : vector<8x256xf32>
    %33 = arith.mulf %32, %22 : vector<8x256xf32>
    %cst_15 = arith.constant 0.254829586 : f32
    %34 = vector.broadcast %cst_15 : f32 to vector<8x256xf32>
    %35 = arith.addf %33, %34 : vector<8x256xf32>
    %36 = arith.mulf %35, %22 : vector<8x256xf32>
    %cst_16 = arith.constant 0.000000e+00 : f32
    %37 = vector.broadcast %cst_16 : f32 to vector<8x256xf32>
    %38 = arith.subf %37, %13 : vector<8x256xf32>
    %39 = arith.mulf %38, %13 : vector<8x256xf32>
    %40 = math.exp %39 : vector<8x256xf32>
    %41 = arith.mulf %36, %40 : vector<8x256xf32>
    %cst_17 = arith.constant 1.000000e+00 : f32
    %42 = vector.broadcast %cst_17 : f32 to vector<8x256xf32>
    %43 = arith.subf %42, %41 : vector<8x256xf32>
    %cst_18 = arith.constant 0.000000e+00 : f32
    %44 = vector.broadcast %cst_18 : f32 to vector<8x256xf32>
    %45 = arith.cmpf olt, %12, %44 : vector<8x256xf32>
    %cst_19 = arith.constant 0.000000e+00 : f32
    %46 = vector.broadcast %cst_19 : f32 to vector<8x256xf32>
    %47 = arith.subf %46, %43 : vector<8x256xf32>
    %48 = arith.select %45, %47, %43 : vector<8x256xi1>, vector<8x256xf32>
    %cst_20 = arith.constant 1.000000e+00 : f32
    %49 = vector.broadcast %cst_20 : f32 to vector<8x256xf32>
    %50 = arith.addf %49, %48 : vector<8x256xf32>
    %51 = arith.mulf %10, %50 : vector<8x256xf32>
    %c0_21 = arith.constant 0 : index
    %c0_22 = arith.constant 0 : index
    %52 = vector.load %arg8[%c0_21, %c0_22] : memref<8x256xf32, #tpu.memory_space<vmem>>, vector<8x256xf32>
    %c0_23 = arith.constant 0 : index
    %c0_24 = arith.constant 0 : index
    %53 = vector.load %arg5[%c0_23, %c0_24] : memref<256x256xf32, #tpu.memory_space<vmem>>, vector<256x256xf32>
    %cst_25 = arith.constant dense<0.000000e+00> : vector<8x256xf32>
    %54 = tpu.matmul %51, %53, %cst_25 {dimension_numbers = #tpu.dot_dimension_numbers<[1], [0], [0], [1], [0, 0, 1, 1], [], []>} : vector<8x256xf32>, vector<256x256xf32>, vector<8x256xf32> -> vector<8x256xf32>
    %55 = arith.addf %52, %54 : vector<8x256xf32>
    %c0_26 = arith.constant 0 : index
    %c0_27 = arith.constant 0 : index
    %56 = vector.load %arg8[%c0_26, %c0_27] : memref<8x256xf32, #tpu.memory_space<vmem>>, vector<8x256xf32>
    tpu.vector_store %arg8[%c0_26, %c0_27], %55 {strides = array<i32>} : memref<8x256xf32, #tpu.memory_space<vmem>>, vector<8x256xf32>,
    %c1_i32 = arith.constant 1 : i32
    %57 = arith.cmpi eq, %arg1, %c1_i32 : i32
    %58 = arith.extui %57 : i1 to i32
    %c0_i32_28 = arith.constant 0 : i32
    %59 = arith.cmpi ne, %58, %c0_i32_28 : i32
    scf.if %59 {
      %c0_29 = arith.constant 0 : index
      %c0_30 = arith.constant 0 : index
      %60 = vector.load %arg8[%c0_29, %c0_30] : memref<8x256xf32, #tpu.memory_space<vmem>>, vector<8x256xf32>
      %c0_31 = arith.constant 0 : index
      %c0_32 = arith.constant 0 : index
      %61 = vector.load %arg6[%c0_31, %c0_32] : memref<1x256xf32, #tpu.memory_space<vmem>>, vector<1x256xf32>
      %62 = vector.broadcast %61 : vector<1x256xf32> to vector<8x256xf32>
      %63 = arith.addf %60, %62 : vector<8x256xf32>
      %c0_33 = arith.constant 0 : index
      %c0_34 = arith.constant 0 : index
      %64 = vector.load %arg7[%c0_33, %c0_34] : memref<8x256xf32, #tpu.memory_space<vmem>>, vector<8x256xf32>
      tpu.vector_store %arg7[%c0_33, %c0_34], %63 {strides = array<i32>} : memref<8x256xf32, #tpu.memory_space<vmem>>, vector<8x256xf32>,
    } else {
    }
    return
  }
  func.func @transform_0(%arg0: i32, %arg1: i32) -> (i32, i32) {
    %c0_i32 = arith.constant 0 : i32
    %c0_i32_0 = arith.constant 0 : i32
    return %arg0, %c0_i32 : i32, i32
  }
  func.func @transform_1(%arg0: i32, %arg1: i32) -> (i32, i32) {
    %c0_i32 = arith.constant 0 : i32
    %c0_i32_0 = arith.constant 0 : i32
    return %c0_i32, %arg1 : i32, i32
  }
  func.func @transform_2(%arg0: i32, %arg1: i32) -> (i32, i32) {
    %c0_i32 = arith.constant 0 : i32
    %c0_i32_0 = arith.constant 0 : i32
    return %c0_i32, %arg1 : i32, i32
  }
  func.func @transform_3(%arg0: i32, %arg1: i32) -> (i32, i32) {
    %c0_i32 = arith.constant 0 : i32
    %c0_i32_0 = arith.constant 0 : i32
    return %arg1, %c0_i32 : i32, i32
  }
  func.func @transform_4(%arg0: i32, %arg1: i32) -> (i32, i32) {
    %c0_i32 = arith.constant 0 : i32
    %c0_i32_0 = arith.constant 0 : i32
    %c0_i32_1 = arith.constant 0 : i32
    return %c0_i32, %c0_i32_0 : i32, i32
  }
  func.func @transform_5(%arg0: i32, %arg1: i32) -> (i32, i32) {
    %c0_i32 = arith.constant 0 : i32
    %c0_i32_0 = arith.constant 0 : i32
    return %arg0, %c0_i32 : i32, i32
  }
}

</mosaic_0001>

<bundles_post_ra>
// kernel: tpu_custom_call.1
= control target key start
LH: loop header
LB: loop body
LE: loop exit
PB: predicated region body
PF: predicated region fallthrough
CT: control target
= control target key end

     0   :  { %s1809_s0 = inlined_call_operand.hbm [shape: f32[16,256], index: 0, kind: input, shape index: {}]   ;;  %s1810_s1 = inlined_call_operand.hbm [shape: f32[256,512], index: 1, kind: input, shape index: {}]   ;;  %s1811_s2 = inlined_call_operand.hbm [shape: f32[1,512], index: 2, kind: input, shape index: {}]   ;;  %s1812_s3 = inlined_call_operand.hbm [shape: f32[512,256], index: 3, kind: input, shape index: {}]   ;;  %s1813_s4 = inlined_call_operand.vmem [shape: f32[1,256], index: 4, kind: input, shape index: {}]   ;;  %s1814_s5 = inlined_call_operand.hbm [shape: f32[16,256], index: 5, kind: output, shape index: {}]  }
   0x1   :  { %1828 = sst [smem:[#allocation27_spill]] %s1809_s0 }
   0x2   :  { %1829 = sst [smem:[#allocation28_spill]] %s1810_s1 }
   0x3   :  { %1830 = sst [smem:[#allocation29_spill]] %s1813_s4 }
   0x4   :  { %1831 = sst [smem:[#allocation30_spill]] %s1814_s5 }
   0x5   :  { %10 = vsyncpa [#allocation4], 0 }
   0x6   :  { %12 = vsyncpa [#allocation4 + $0x1], 0 }
   0x7   :  { %13 = vsyncpa [#allocation7], 0 }
   0x8   :  { %15 = vsyncpa [#allocation7 + $0x1], 0 }
   0x9   :  { %16 = vsyncpa [#allocation10], 0 }
   0xa   :  { %18 = vsyncpa [#allocation10 + $0x1], 0 }
   0xb   :  { %19 = vsyncpa [#allocation5], 0 }
   0xc   :  { %21 = vsyncpa [#allocation5 + $0x1], 0  ;;  %s1374_s18 = smov 0   ;;  %s1376_s19 = smov 0  }
   0xd   :  { %s1378_s20 = smov 0   ;;  %s1380_s21 = smov 0  }
   0xe   :  { %s1382_s22 = smov 0   ;;  %s1384_s23 = smov 0  }
   0xf   :  { %s1386_s24 = smov 0   ;;  %s1388_s25 = smov 0  }
  0x10   :  { %s1390_s26 = smov 0   ;;  %s1392_s27 = smov 0  }
  0x11   :  { %s1394_s28 = smov 0  }
  0x12 LB: > { %1832 = sst [smem:[#allocation16_spill]] %s1306_s20  ;;  %p54_p0 = scmp.eq.s32.totalorder %s1338_s28, 0  ;;  %s1338_s28 = sphi %s1394_s28, %s27_s28   ;;  %s1334_s27 = sphi %s1392_s27, %s1869_s27   ;;  %s1330_s26 = sphi %s1390_s26, %s1875_s26   ;;  %s1326_s25 = sphi %s1388_s25, %s1867_s25   ;;  %s1322_s24 = sphi %s1386_s24, %s1874_s24   ;;  %s1318_s23 = sphi %s1384_s23, %s1866_s23   ;;  %s1314_s22 = sphi %s1382_s22, %s1873_s22   ;;  %s1310_s21 = sphi %s1380_s21, %s1872_s21   ;;  %s1306_s20 = sphi %s1378_s20, %s1864_s20   ;;  %s1302_s19 = sphi %s1376_s19, %s1871_s19   ;;  %s1298_s18 = sphi %s1374_s18, %s1870_s18  }
  0x13   : > { %1833 = sst [smem:[#allocation17_spill]] %s1310_s21  ;;  %p79_p1 = scmp.ne.s32.totalorder %s1306_s20, %s1302_s19 }
  0x14   : > { %1834 = sst [smem:[#allocation18_spill]] %s1318_s23  ;;  %p986_p2 = scmp.lt.s32.totalorder %s1338_s28, 4 }
  0x15   : > { %1835 = sst [smem:[#allocation19_spill]] %s1326_s25  ;;  %s231_s30 = sand.u32 1, %s1338_s28  }
  0x16   : > { %1836 = sst [smem:[#allocation20_spill]] %s1334_s27  ;;  %p81_p3 = por %p79_p1, %p54_p0 }
  0x17   : > { %1837 = sst [smem:[#allocation21_spill]] %s1338_s28  ;;  %s1438_s6 = sand.u32 1, %s1306_s20  }
  0x18   : > { %s955_s7 = sshll.u32 %s1330_s26, 4  ;;  %s1815_s8 = sshll.u32 %s1438_s6, 9 }
  0x19   : > { %s1838_s1 = sld [smem:[#allocation28_spill]]  ;;  %s235_s13 = scalar_lea.vmem [#allocation6], %s1815_s8 }
  0x1a   : > { %s243_s14 = sshll.u32 %s235_s13, 4  ;;  %p1449_p4 = pnand %p986_p2, %p81_p3  ;;  %s244_s14 = int_to_ptr.vmem [resolvable:$true] %s243_s14 }
  0x1b   : > { %s1453_s16 = scalar_lea.sflag [#allocation7], %s231_s30  ;;  %s1340_s17 = smov 512  }
  0x1c   : > { %s1817_s9 = smov 16   ;;  %p941_p5 = scmp.ge.s32.totalorder %s1338_s28, 1 }
  0x1d   : > { %p293_p6 = scmp.lt.s32.totalorder %s1338_s28, 5  ;;  %s1467_s10 = sadd.s32 4294967295, %s1338_s28  }
  0x1e   : > { %s36_s13 = sadd.s32 1, %s1330_s26  ;;  %s39_s8 = sadd.s32 1, %s1334_s27 }
  0x1f   : > { %s240_s11 = scalar_lea.hbm %s1838_s1, %s955_s7  ;;  %s1816_s7 = smov 256  }
  0x20   : > { %s241_s12 = sshll.u32 %s240_s11, 4  ;;  %p1462_p7 = pnand %p941_p5, %p293_p6  ;;  %s242_s12 = int_to_ptr.hbm [resolvable:$true] %s241_s12 }
  0x21   : > { %975 = dma.hbm_to_vmem [thread:$0]  (!%p1449_p4), %s242_s12, 8192, %s244_s14, %s1453_s16, %s1340_s17, %s1816_s7, %s1817_s9  }
  0x22   : > { %s926_s11 = sadd.s32 4294967294, %s1338_s28   ;;  %p37_p8 = scmp.ge.s32.totalorder %s36_s13, 2 }
  0x23   : > { %s46_s12 = sadd.s32 1, %s1318_s23  ;;  %p53_p9 = scmp.ne.s32.totalorder %s1318_s23, %s1314_s22 }
  0x24   : > { %s1877_s13 = smov (%p37_p8, %s36_s13), 0  ;;  %s1879_s8 = smov (!%p37_p8, %s39_s8), %s1334_s27 }
  0x25   : > { %1841 = sst [smem:[#allocation22_spill]] %s1877_s13  ;;  %p1483_p10 = por %p54_p0, %p53_p9 }
  0x26   : > { %p59_p11 = scmp.ne.s32.totalorder %s1314_s22, %s1310_s21  ;;  %p41_p12 = scmp.ge.s32.totalorder %s1879_s8, 2 }
  0x27   : > { %p60_p13 = scmp.eq.s32.totalorder %s1467_s10, 0  ;;  %s69_s17 = ssub.s32 %s1330_s26, %s1877_s13 }
  0x28   : > { %p85_p1 = scmp.ne.s32.totalorder %s1302_s19, %s1298_s18  ;;  %s1881_s8 = smov (%p41_p12, %s1879_s8), 0 }
  0x29   : > { %1843 = sst [smem:[#allocation23_spill]] %s1881_s8  ;;  %p1499_p3 = por %p60_p13, %p59_p11 }
  0x2a   : > { %p70_p0 = scmp.eq.s32.totalorder %s69_s17, 0  ;;  %s43_s9 = ssub.s32 %s1334_s27, %s1881_s8 }
  0x2b   : > { %p1505_p5 = por %p85_p1, %p60_p13  ;;  %p44_p6 = scmp.eq.s32.totalorder %s43_s9, 0 }
  0x2c   : > { %p182_p8 = scmp.eq.s32.totalorder %s1467_s10, 3  ;;  %s1846_s1 = sadd.s32 1, %s1306_s20 }
  0x2d   : > { %s1513_s18 = scalar_select %p70_p0, %s1306_s20, %s1846_s1  }
  0x2e   : > { %s1516_s13 = scalar_select %p44_p6, %s1318_s23, %s46_s12  }
  0x2f   : > { %1847 = sst [smem:[#allocation24_spill]] %s1513_s18  ;;  %p1521_p12 = por %p182_p8, %p53_p9 }
  0x30   : > { %1848 = sst [smem:[#allocation25_spill]] %s1516_s13  ;;  %p188_p13 = scmp.eq.s32.totalorder %s926_s11, 3 }
  0x31   : > { %s211_s17 = sand.u32 1, %s1318_s23   ;;  %s954_s8 = sshll.u32 %s1334_s27, 4 }
  0x32   : > { %p1530_p1 = por %p188_p13, %p59_p11  ;;  %s929_s25 = sshll.u32 %s211_s17, 4 }
  0x33   : > { %s1852_s0 = sld [smem:[#allocation27_spill]]  ;;  %s215_s13 = scalar_lea.vmem [#allocation3], %s929_s25 }
  0x34   : > { %s1850_s9 = scalar_select %p1530_p1, 1, 0 }
  0x35   : > { %s224_s20 = sshll.u32 %s215_s13, 4  ;;  %p970_p9 = pnand %p986_p2, %p1483_p10  ;;  %s225_s20 = int_to_ptr.vmem [resolvable:$true] %s224_s20 }
  0x36   : > { %1851 = sst [smem:[#allocation26_spill]] %s1850_s9  ;;  %s935_s11 = sshll.u32 %s1438_s6, 1 }
  0x37   : > { %s936_s27 = sshll.u32 %s1330_s26, 1  ;;  %s212_s23 = scalar_lea.sflag [#allocation4], %s211_s17 }
  0x38   : > { %s957_s25 = sshll.u32 %s1330_s26, 9  ;;  %s1853_s17 = sshll.u32 %s1438_s6, 9 }
  0x39   : > { %s220_s18 = scalar_lea.hbm %s1852_s0, %s954_s8  ;;  %s261_s8 = scalar_lea.hbm %s1811_s2, %s936_s27 }
  0x3a   : > { %s222_s12 = sshll.u32 %s220_s18, 4  ;;  %s257_s18 = scalar_lea.vmem [#allocation8], %s935_s11  ;;  %s223_s12 = int_to_ptr.hbm [resolvable:$true] %s222_s12 }
  0x3b   : > { %972 = dma.hbm_to_vmem [thread:$0]  (!%p970_p9), %s223_s12, 256, %s225_s20, %s212_s23  }
  0x3c   : > { %s265_s1 = sshll.u32 %s257_s18, 4  ;;  %s263_s0 = sshll.u32 %s261_s8, 4  ;;  %s266_s1 = int_to_ptr.vmem [resolvable:$true] %s265_s1  ;;  %s264_s0 = int_to_ptr.hbm [resolvable:$true] %s263_s0 }
  0x3d   : > { %978 = dma.hbm_to_vmem [thread:$0]  (!%p1449_p4), %s264_s0, 32, %s266_s1, %s1453_s16  }
  0x3e   : > { %s282_s21 = scalar_lea.hbm %s1812_s3, %s957_s25  ;;  %s276_s28 = scalar_lea.vmem [#allocation9], %s1853_s17 }
  0x3f   : > { %s285_s20 = sshll.u32 %s276_s28, 4  ;;  %s283_s23 = sshll.u32 %s282_s21, 4  ;;  %s286_s20 = int_to_ptr.vmem [resolvable:$true] %s285_s20  ;;  %s284_s23 = int_to_ptr.hbm [resolvable:$true] %s283_s23 }
  0x40   : > { %s273_s9 = scalar_lea.sflag [#allocation10], %s1438_s6  ;;  %s1854_s27 = smov 16  }
  0x41   : > { %s1855_s12 = smov 256   ;;  %297 = sbr.rel (%p1462_p7) target bundleno = 474 (0x1da), region = 40 }
  0x42   : > { %981 = dma.hbm_to_vmem [thread:$0]  (!%p1449_p4), %s284_s23, 8192, %s286_s20, %s273_s9, %s1855_s12, %s1855_s12, %s1854_s27  }
  0x43   : > { %s1564_s0 = sand.u32 (!%p1462_p7), 1, %s1314_s22  }
  0x44   : > { %s942_s16 = sshll.u32 (!%p1462_p7), %s1564_s0, 4  ;;  %s300_s28 = scalar_lea.sflag (!%p1462_p7), [#allocation4], %s1564_s0 }
  0x45   : > { %s1568_s21 = scalar_lea.vmem (!%p1462_p7), [#allocation3], %s942_s16 }
  0x46   : > { %1281 = dma.done.wait (%p1499_p3), %s300_s28, 256  }
  0x47   : > { %1283 = vsyncadd (%p1499_p3), %s300_s28, 4294967040  ;;  %s309_s6 = sand.u32 1, %s1467_s10   ;;  %s311_s15 = sand.u32 1, %s1302_s19  }
  0x48   : > { %s943_s30 = sshll.u32 %s311_s15, 9  ;;  %s310_s11 = scalar_lea.sflag [#allocation7], %s309_s6 }
  0x49   : > { %s1576_s4 = scalar_lea.vmem [#allocation6], %s943_s30 }
  0x4a   : > { %1285 = dma.done.wait (%p1505_p5), %s310_s11, 8224  }
  0x4b   : > { %1287 = vsyncadd (%p1505_p5), %s310_s11, 4294959072  ;;  %s944_s8 = sshll.u32 %s311_s15, 1  ;;  %s330_s7 = scalar_lea.sflag [#allocation10], %s311_s15 }
  0x4c   : > { %s1582_s18 = scalar_lea.vmem [#allocation8], %s944_s8  ;;  %s1584_s1 = scalar_lea.vmem [#allocation9], %s943_s30 }
  0x4d   : > { %1289 = dma.done.wait (%p1505_p5), %s330_s7, 8192  }
  0x4e   : > { %1291 = vsyncadd (%p1505_p5), %s330_s7, 4294959104  ;;  %s1590_s10 = scalar_lea.vmem [#allocation11], %s942_s16  ;;  %p947_p2 = scmp.ne.s32.totalorder %s1322_s24, 0 }
  0x50   : > { %382 = sbr.rel (%p947_p2) target bundleno = 88 (0x58), region = 60 }
  0x55   : > { %v1343_v0 = vmov 0.0  }
  0x56   : > { %383 = vst [vmem:[#allocation2] sm:$0xff] %v1343_v0 }
  0x57   : > { %384 = vst [vmem:[#allocation2 + $0x8] sm:$0xff] %v1343_v0 }
  0x58 PF: > { %v417_v1 = vld [vmem:[%s1576_s4 + $0xf0] sm:$0xff]  ;;  %v418_v2 = vld [vmem:[%s1576_s4 + $0xf8] sm:$0xff]  ;;  %v415_v3 = vld [vmem:[%s1576_s4 + $0xe0] sm:$0xff]  ;;  %p948_p4 = scmp.ne.s32.totalorder %s1322_s24, 1 }
  0x59   : > { %457 = vmatpush.msra.mxu0 %v417_v1  ;;  %497 = vmatpush.msra.mxu2 %v418_v2  ;;  %v449_v4 = vld [vmem:[%s1576_s4 + $0x1f0] sm:$0xff]  ;;  %v416_v5 = vld [vmem:[%s1576_s4 + $0xe8] sm:$0xff]  ;;  %v450_v6 = vld [vmem:[%s1576_s4 + $0x1f8] sm:$0xff]  ;;  %s1856_s13 = sld [smem:[#allocation29_spill]] (!%p948_p4) }
  0x5a   : > { %477 = vmatpush.msra.mxu1 %v449_v4  ;;  %517 = vmatpush.msra.mxu3 %v450_v6  ;;  %v413_v7 = vld [vmem:[%s1576_s4 + $0xd0] sm:$0xff]  ;;  %v447_v8 = vld [vmem:[%s1576_s4 + $0x1e0] sm:$0xff]  ;;  %v414_v9 = vld [vmem:[%s1576_s4 + $0xd8] sm:$0xff] }
  0x5b   : > { %458 = vmatpush.msra.mxu0 %v415_v3  ;;  %498 = vmatpush.msra.mxu2 %v416_v5  ;;  %v448_v10 = vld [vmem:[%s1576_s4 + $0x1e8] sm:$0xff]  ;;  %v445_v11 = vld [vmem:[%s1576_s4 + $0x1d0] sm:$0xff]  ;;  %v411_v12 = vld [vmem:[%s1576_s4 + $0xc0] sm:$0xff] }
  0x5c   : > { %478 = vmatpush.msra.mxu1 %v447_v8  ;;  %518 = vmatpush.msra.mxu3 %v448_v10  ;;  %v412_v13 = vld [vmem:[%s1576_s4 + $0xc8] sm:$0xff]  ;;  %v446_v14 = vld [vmem:[%s1576_s4 + $0x1d8] sm:$0xff]  ;;  %v443_v15 = vld [vmem:[%s1576_s4 + $0x1c0] sm:$0xff] }
  0x5d   : > { %459 = vmatpush.msra.mxu0 %v413_v7  ;;  %499 = vmatpush.msra.mxu2 %v414_v9  ;;  %v444_v16 = vld [vmem:[%s1576_s4 + $0x1c8] sm:$0xff]  ;;  %v409_v17 = vld [vmem:[%s1576_s4 + $0xb0] sm:$0xff]  ;;  %v410_v18 = vld [vmem:[%s1576_s4 + $0xb8] sm:$0xff] }
  0x5e   : > { %479 = vmatpush.msra.mxu1 %v445_v11  ;;  %519 = vmatpush.msra.mxu3 %v446_v14  ;;  %v441_v19 = vld [vmem:[%s1576_s4 + $0x1b0] sm:$0xff]  ;;  %v442_v20 = vld [vmem:[%s1576_s4 + $0x1b8] sm:$0xff]  ;;  %v407_v21 = vld [vmem:[%s1576_s4 + $0xa0] sm:$0xff] }
  0x5f   : > { %460 = vmatpush.msra.mxu0 %v411_v12  ;;  %500 = vmatpush.msra.mxu2 %v412_v13  ;;  %v408_v22 = vld [vmem:[%s1576_s4 + $0xa8] sm:$0xff]  ;;  %v439_v23 = vld [vmem:[%s1576_s4 + $0x1a0] sm:$0xff]  ;;  %v405_v25 = vld [vmem:[%s1576_s4 + $0x90] sm:$0xff] }
  0x60   : > { %480 = vmatpush.msra.mxu1 %v443_v15  ;;  %520 = vmatpush.msra.mxu3 %v444_v16  ;;  %v440_v24 = vld [vmem:[%s1576_s4 + $0x1a8] sm:$0xff]  ;;  %v406_v26 = vld [vmem:[%s1576_s4 + $0x98] sm:$0xff]  ;;  %v437_v27 = vld [vmem:[%s1576_s4 + $0x190] sm:$0xff] }
  0x61   : > { %461 = vmatpush.msra.mxu0 %v409_v17  ;;  %501 = vmatpush.msra.mxu2 %v410_v18  ;;  %v438_v28 = vld [vmem:[%s1576_s4 + $0x198] sm:$0xff]  ;;  %v403_v29 = vld [vmem:[%s1576_s4 + $0x80] sm:$0xff]  ;;  %v404_v30 = vld [vmem:[%s1576_s4 + $0x88] sm:$0xff] }
  0x62   : > { %481 = vmatpush.msra.mxu1 %v441_v19  ;;  %521 = vmatpush.msra.mxu3 %v442_v20  ;;  %v435_v31 = vld [vmem:[%s1576_s4 + $0x180] sm:$0xff]  ;;  %v436_v32 = vld [vmem:[%s1576_s4 + $0x188] sm:$0xff]  ;;  %v401_v33 = vld [vmem:[%s1576_s4 + $0x70] sm:$0xff] }
  0x63   : > { %462 = vmatpush.msra.mxu0 %v407_v21  ;;  %502 = vmatpush.msra.mxu2 %v408_v22  ;;  %v402_v34 = vld [vmem:[%s1576_s4 + $0x78] sm:$0xff]  ;;  %v433_v35 = vld [vmem:[%s1576_s4 + $0x170] sm:$0xff]  ;;  %v399_v37 = vld [vmem:[%s1576_s4 + $0x60] sm:$0xff] }
  0x64   : > { %482 = vmatpush.msra.mxu1 %v439_v23  ;;  %522 = vmatpush.msra.mxu3 %v440_v24  ;;  %v434_v36 = vld [vmem:[%s1576_s4 + $0x178] sm:$0xff]  ;;  %v400_v38 = vld [vmem:[%s1576_s4 + $0x68] sm:$0xff]  ;;  %v431_v39 = vld [vmem:[%s1576_s4 + $0x160] sm:$0xff] }
  0x65   : > { %463 = vmatpush.msra.mxu0 %v405_v25  ;;  %503 = vmatpush.msra.mxu2 %v406_v26  ;;  %v432_v40 = vld [vmem:[%s1576_s4 + $0x168] sm:$0xff]  ;;  %v397_v41 = vld [vmem:[%s1576_s4 + $0x50] sm:$0xff]  ;;  %v398_v42 = vld [vmem:[%s1576_s4 + $0x58] sm:$0xff] }
  0x66   : > { %483 = vmatpush.msra.mxu1 %v437_v27  ;;  %523 = vmatpush.msra.mxu3 %v438_v28  ;;  %v429_v43 = vld [vmem:[%s1576_s4 + $0x150] sm:$0xff]  ;;  %v430_v44 = vld [vmem:[%s1576_s4 + $0x158] sm:$0xff]  ;;  %v395_v45 = vld [vmem:[%s1576_s4 + $0x40] sm:$0xff] }
  0x67   : > { %464 = vmatpush.msra.mxu0 %v403_v29  ;;  %504 = vmatpush.msra.mxu2 %v404_v30  ;;  %v396_v46 = vld [vmem:[%s1576_s4 + $0x48] sm:$0xff]  ;;  %v427_v47 = vld [vmem:[%s1576_s4 + $0x140] sm:$0xff]  ;;  %v393_v49 = vld [vmem:[%s1576_s4 + $0x30] sm:$0xff] }
  0x68   : > { %484 = vmatpush.msra.mxu1 %v435_v31  ;;  %524 = vmatpush.msra.mxu3 %v436_v32  ;;  %v428_v48 = vld [vmem:[%s1576_s4 + $0x148] sm:$0xff]  ;;  %v394_v50 = vld [vmem:[%s1576_s4 + $0x38] sm:$0xff]  ;;  %v425_v51 = vld [vmem:[%s1576_s4 + $0x130] sm:$0xff] }
  0x69   : > { %465 = vmatpush.msra.mxu0 %v401_v33  ;;  %505 = vmatpush.msra.mxu2 %v402_v34  ;;  %v426_v52 = vld [vmem:[%s1576_s4 + $0x138] sm:$0xff]  ;;  %v391_v53 = vld [vmem:[%s1576_s4 + $0x20] sm:$0xff]  ;;  %v392_v54 = vld [vmem:[%s1576_s4 + $0x28] sm:$0xff] }
  0x6a   : > { %485 = vmatpush.msra.mxu1 %v433_v35  ;;  %525 = vmatpush.msra.mxu3 %v434_v36  ;;  %v423_v55 = vld [vmem:[%s1576_s4 + $0x120] sm:$0xff]  ;;  %v424_v56 = vld [vmem:[%s1576_s4 + $0x128] sm:$0xff]  ;;  %v389_v57 = vld [vmem:[%s1576_s4 + $0x10] sm:$0xff] }
  0x6b   : > { %466 = vmatpush.msra.mxu0 %v399_v37  ;;  %506 = vmatpush.msra.mxu2 %v400_v38  ;;  %v390_v58 = vld [vmem:[%s1576_s4 + $0x18] sm:$0xff]  ;;  %v421_v59 = vld [vmem:[%s1576_s4 + $0x110] sm:$0xff]  ;;  %v387_v61 = vld [vmem:[%s1576_s4] sm:$0xff] }
  0x6c   : > { %486 = vmatpush.msra.mxu1 %v431_v39  ;;  %526 = vmatpush.msra.mxu3 %v432_v40  ;;  %v422_v60 = vld [vmem:[%s1576_s4 + $0x118] sm:$0xff]  ;;  %v388_v62 = vld [vmem:[%s1576_s4 + $0x8] sm:$0xff]  ;;  %v385_v63 = vld [vmem:[%s1568_s21] sm:$0xff] }
  0x6d   : > { %467 = vmatpush.msra.mxu0 %v397_v41  ;;  %507 = vmatpush.msra.mxu2 %v398_v42  ;;  %v419_v0 = vld [vmem:[%s1576_s4 + $0x100] sm:$0xff]  ;;  %v420_v1 = vld [vmem:[%s1576_s4 + $0x108] sm:$0xff]  ;;  %v627_v3 = vld [vmem:[%s1584_s1 + $0xf0] sm:$0xff] }
  0x6e   : > { %487 = vmatpush.msra.mxu1 %v429_v43  ;;  %527 = vmatpush.msra.mxu3 %v430_v44  ;;  %v386_v2 = vld [vmem:[%s1568_s21 + $0x8] sm:$0xff]  ;;  %v451_v7 = vld [vmem:[%s1582_s18] sm:$0x3] }
  0x6f   : > { %468 = vmatpush.msra.mxu0 %v395_v45  ;;  %508 = vmatpush.msra.mxu2 %v396_v46  ;;  %v628_v4 = vld [vmem:[%s1584_s1 + $0xf8] sm:$0xff]  ;;  %v625_v5 = vld [vmem:[%s1584_s1 + $0xe0] sm:$0xff]  ;;  %v626_v6 = vld [vmem:[%s1584_s1 + $0xe8] sm:$0xff]  ;;  %v453_v10 = vperm.slane %v451_v7, 0  ;;  %v454_v31 = vperm.slane %v451_v7, 1 }
  0x70   : > { %488 = vmatpush.msra.mxu1 %v427_v47  ;;  %528 = vmatpush.msra.mxu3 %v428_v48  ;;  %v623_v8 = vld [vmem:[%s1584_s1 + $0xd0] sm:$0xff]  ;;  %v624_v9 = vld [vmem:[%s1584_s1 + $0xd8] sm:$0xff]  ;;  %v621_v11 = vld [vmem:[%s1584_s1 + $0xc0] sm:$0xff] }
  0x71   : > { %469 = vmatpush.msra.mxu0 %v393_v49  ;;  %509 = vmatpush.msra.mxu2 %v394_v50  ;;  %v659_v12 = vld [vmem:[%s1584_s1 + $0x1f0] sm:$0xff]  ;;  %v622_v13 = vld [vmem:[%s1584_s1 + $0xc8] sm:$0xff]  ;;  %v660_v14 = vld [vmem:[%s1584_s1 + $0x1f8] sm:$0xff] }
  0x72   : > { %489 = vmatpush.msra.mxu1 %v425_v51  ;;  %529 = vmatpush.msra.mxu3 %v426_v52  ;;  %v619_v15 = vld [vmem:[%s1584_s1 + $0xb0] sm:$0xff]  ;;  %v657_v16 = vld [vmem:[%s1584_s1 + $0x1e0] sm:$0xff]  ;;  %v620_v17 = vld [vmem:[%s1584_s1 + $0xb8] sm:$0xff] }
  0x73   : > { %470 = vmatpush.msra.mxu0 %v391_v53  ;;  %510 = vmatpush.msra.mxu2 %v392_v54  ;;  %v658_v18 = vld [vmem:[%s1584_s1 + $0x1e8] sm:$0xff]  ;;  %v617_v19 = vld [vmem:[%s1584_s1 + $0xa0] sm:$0xff]  ;;  %v655_v21 = vld [vmem:[%s1584_s1 + $0x1d0] sm:$0xff] }
  0x74   : > { %490 = vmatpush.msra.mxu1 %v423_v55  ;;  %530 = vmatpush.msra.mxu3 %v424_v56  ;;  %v618_v22 = vld [vmem:[%s1584_s1 + $0xa8] sm:$0xff]  ;;  %v656_v23 = vld [vmem:[%s1584_s1 + $0x1d8] sm:$0xff]  ;;  %v615_v25 = vld [vmem:[%s1584_s1 + $0x90] sm:$0xff] }
  0x75   : > { %471 = vmatpush.msra.mxu0 %v389_v57  ;;  %511 = vmatpush.msra.mxu2 %v390_v58  ;;  %v653_v26 = vld [vmem:[%s1584_s1 + $0x1c0] sm:$0xff]  ;;  %v616_v28 = vld [vmem:[%s1584_s1 + $0x98] sm:$0xff]  ;;  %v654_v29 = vld [vmem:[%s1584_s1 + $0x1c8] sm:$0xff] }
  0x76   : > { %491 = vmatpush.msra.mxu1 %v421_v59  ;;  %531 = vmatpush.msra.mxu3 %v422_v60  ;;  %v613_v32 = vld [vmem:[%s1584_s1 + $0x80] sm:$0xff]  ;;  %v651_v33 = vld [vmem:[%s1584_s1 + $0x1b0] sm:$0xff]  ;;  %v614_v34 = vld [vmem:[%s1584_s1 + $0x88] sm:$0xff] }
  0x77   : > { %472 = vmatpush.msra.mxu0 %v387_v61  ;;  %512 = vmatpush.msra.mxu2 %v388_v62  ;;  %v652_v35 = vld [vmem:[%s1584_s1 + $0x1b8] sm:$0xff]  ;;  %v611_v37 = vld [vmem:[%s1584_s1 + $0x70] sm:$0xff]  ;;  %v649_v38 = vld [vmem:[%s1584_s1 + $0x1a0] sm:$0xff] }
  0x78   : > { %473 = vmatmul.f32.vlgmr.msra.gmra.mxu0 %v385_v63  ;;  %513 = vmatmul.f32.vlgmr.msra.gmra.mxu2 %v385_v63  ;;  %v612_v40 = vld [vmem:[%s1584_s1 + $0x78] sm:$0xff]  ;;  %v650_v41 = vld [vmem:[%s1584_s1 + $0x1a8] sm:$0xff]  ;;  %v609_v44 = vld [vmem:[%s1584_s1 + $0x60] sm:$0xff] }
  0x79   : > { %492 = vmatpush.msra.mxu1 %v419_v0  ;;  %532 = vmatpush.msra.mxu3 %v420_v1  ;;  %v647_v45 = vld [vmem:[%s1584_s1 + $0x190] sm:$0xff]  ;;  %v610_v47 = vld [vmem:[%s1584_s1 + $0x68] sm:$0xff]  ;;  %v648_v48 = vld [vmem:[%s1584_s1 + $0x198] sm:$0xff] }
  0x7a   : > { %493 = vmatmul.f32.vlgmr.msra.gmra.mxu1 %v386_v2  ;;  %533 = vmatmul.f32.vlgmr.msra.gmra.mxu3 %v386_v2  ;;  %v607_v51 = vld [vmem:[%s1584_s1 + $0x50] sm:$0xff]  ;;  %v645_v52 = vld [vmem:[%s1584_s1 + $0x180] sm:$0xff]  ;;  %v608_v53 = vld [vmem:[%s1584_s1 + $0x58] sm:$0xff] }
  0x7b   : > { %661 = vmatpush.msrb.mxu0 %v627_v3  ;;  %701 = vmatpush.msrb.mxu2 %v628_v4  ;;  %v646_v54 = vld [vmem:[%s1584_s1 + $0x188] sm:$0xff]  ;;  %v605_v57 = vld [vmem:[%s1584_s1 + $0x40] sm:$0xff]  ;;  %v643_v58 = vld [vmem:[%s1584_s1 + $0x170] sm:$0xff] }
  0x7c   : > { %681 = vmatpush.msrb.mxu1 %v659_v12  ;;  %721 = vmatpush.msrb.mxu3 %v660_v14  ;;  %v606_v59 = vld [vmem:[%s1584_s1 + $0x48] sm:$0xff]  ;;  %v644_v60 = vld [vmem:[%s1584_s1 + $0x178] sm:$0xff]  ;;  %v603_v62 = vld [vmem:[%s1584_s1 + $0x30] sm:$0xff] }
  0x7d   : > { %662 = vmatpush.msrb.mxu0 %v625_v5  ;;  %702 = vmatpush.msrb.mxu2 %v626_v6  ;;  %v641_v63 = vld [vmem:[%s1584_s1 + $0x160] sm:$0xff]  ;;  %v604_v0 = vld [vmem:[%s1584_s1 + $0x38] sm:$0xff]  ;;  %v642_v1 = vld [vmem:[%s1584_s1 + $0x168] sm:$0xff] }
  0x7e   : > { %682 = vmatpush.msrb.mxu1 %v657_v16  ;;  %722 = vmatpush.msrb.mxu3 %v658_v18  ;;  %v601_v3 = vld [vmem:[%s1584_s1 + $0x20] sm:$0xff]  ;;  %v639_v4 = vld [vmem:[%s1584_s1 + $0x150] sm:$0xff]  ;;  %v602_v5 = vld [vmem:[%s1584_s1 + $0x28] sm:$0xff] }
  0x7f   : > { %663 = vmatpush.msrb.mxu0 %v623_v8  ;;  %703 = vmatpush.msrb.mxu2 %v624_v9  ;;  %v640_v6 = vld [vmem:[%s1584_s1 + $0x158] sm:$0xff]  ;;  %v599_v8 = vld [vmem:[%s1584_s1 + $0x10] sm:$0xff]  ;;  %v637_v9 = vld [vmem:[%s1584_s1 + $0x140] sm:$0xff] }
  0x80   : > { %683 = vmatpush.msrb.mxu1 %v655_v21  ;;  %723 = vmatpush.msrb.mxu3 %v656_v23  ;;  %v635_v14 = vld [vmem:[%s1584_s1 + $0x130] sm:$0xff]  ;;  %v598_v16 = vld [vmem:[%s1584_s1 + $0x8] sm:$0xff]  ;;  %v632_v23 = vld [vmem:[%s1584_s1 + $0x118] sm:$0xff] }
  0x81   : > { %664 = vmatpush.msrb.mxu0 %v621_v11  ;;  %704 = vmatpush.msrb.mxu2 %v622_v13  ;;  %v638_v11 = vld [vmem:[%s1584_s1 + $0x148] sm:$0xff]  ;;  %v597_v13 = vld [vmem:[%s1584_s1] sm:$0xff]  ;;  %v631_v21 = vld [vmem:[%s1584_s1 + $0x110] sm:$0xff] }
  0x82   : > { %684 = vmatpush.msrb.mxu1 %v653_v26  ;;  %724 = vmatpush.msrb.mxu3 %v654_v29  ;;  %v629_v26 = vld [vmem:[%s1584_s1 + $0x100] sm:$0xff]  ;;  %v630_v29 = vld [vmem:[%s1584_s1 + $0x108] sm:$0xff] }
  0x83   : > { %665 = vmatpush.msrb.mxu0 %v619_v15  ;;  %705 = vmatpush.msrb.mxu2 %v620_v17  ;;  %v636_v17 = vld [vmem:[%s1584_s1 + $0x138] sm:$0xff] }
  0x84   : > { %685 = vmatpush.msrb.mxu1 %v651_v33  ;;  %725 = vmatpush.msrb.mxu3 %v652_v35 }
  0x85   : > { %666 = vmatpush.msrb.mxu0 %v617_v19  ;;  %706 = vmatpush.msrb.mxu2 %v618_v22  ;;  %v633_v19 = vld [vmem:[%s1584_s1 + $0x120] sm:$0xff] }
  0x86   : > { %686 = vmatpush.msrb.mxu1 %v649_v38  ;;  %726 = vmatpush.msrb.mxu3 %v650_v41 }
  0x87   : > { %667 = vmatpush.msrb.mxu0 %v615_v25  ;;  %707 = vmatpush.msrb.mxu2 %v616_v28 }
  0x88   : > { %687 = vmatpush.msrb.mxu1 %v647_v45  ;;  %727 = vmatpush.msrb.mxu3 %v648_v48 }
  0x89   : > { %668 = vmatpush.msrb.mxu0 %v613_v32  ;;  %708 = vmatpush.msrb.mxu2 %v614_v34 }
  0x8a   : > { %688 = vmatpush.msrb.mxu1 %v645_v52  ;;  %728 = vmatpush.msrb.mxu3 %v646_v54 }
  0x8b   : > { %669 = vmatpush.msrb.mxu0 %v611_v37  ;;  %709 = vmatpush.msrb.mxu2 %v612_v40 }
  0x8c   : > { %689 = vmatpush.msrb.mxu1 %v643_v58  ;;  %729 = vmatpush.msrb.mxu3 %v644_v60 }
  0x8d   : > { %670 = vmatpush.msrb.mxu0 %v609_v44  ;;  %710 = vmatpush.msrb.mxu2 %v610_v47 }
  0x8e   : > { %690 = vmatpush.msrb.mxu1 %v641_v63  ;;  %730 = vmatpush.msrb.mxu3 %v642_v1 }
  0x8f   : > { %671 = vmatpush.msrb.mxu0 %v607_v51  ;;  %711 = vmatpush.msrb.mxu2 %v608_v53 }
  0x90   : > { %691 = vmatpush.msrb.mxu1 %v639_v4  ;;  %731 = vmatpush.msrb.mxu3 %v640_v6 }
  0x91   : > { %672 = vmatpush.msrb.mxu0 %v605_v57  ;;  %712 = vmatpush.msrb.mxu2 %v606_v59 }
  0x92   : > { %692 = vmatpush.msrb.mxu1 %v637_v9  ;;  %732 = vmatpush.msrb.mxu3 %v638_v11 }
  0x93   : > { %673 = vmatpush.msrb.mxu0 %v603_v62  ;;  %713 = vmatpush.msrb.mxu2 %v604_v0 }
  0x94   : > { %693 = vmatpush.msrb.mxu1 %v635_v14  ;;  %733 = vmatpush.msrb.mxu3 %v636_v17  ;;  %v596_v14 = vld [vmem:[#allocation2 + $0x8] sm:$0xff] }
  0x95   : > { %674 = vmatpush.msrb.mxu0 %v601_v3  ;;  %714 = vmatpush.msrb.mxu2 %v602_v5 }
  0x96   : > { %694 = vmatpush.msrb.mxu1 %v633_v19 }
  0x97   : > { %675 = vmatpush.msrb.mxu0 %v599_v8 }
  0x98   : > { %695 = vmatpush.msrb.mxu1 %v631_v21 }
  0x99   : > { %676 = vmatpush.msrb.mxu0 %v597_v13 }
  0x9a   : > { %696 = vmatpush.msrb.mxu1 %v629_v26 }
  0xf5   : > { %v474_v20 = vpop.f32.mrf.mxu0 }
  0xf6   : > { %v475_v24 = vadd.f32 %v474_v20, %v453_v10  ;;  %v600_v10 = vld [vmem:[%s1584_s1 + $0x18] sm:$0xff]  ;;  %v634_v20 = vld [vmem:[%s1584_s1 + $0x128] sm:$0xff] }
  0xf7   : > { %v494_v27 = vpop.f32.mrf.mxu1  ;;  %715 = vmatpush.msrb.mxu2 %v600_v10  ;;  %734 = vmatpush.msrb.mxu3 %v634_v20  ;;  %v595_v10 = vld [vmem:[#allocation2] sm:$0xff] }
  0xf8   : > { %v1682_v30 = vadd.f32 %v494_v27, %v475_v24 }
  0xf9   : > { %716 = vmatpush.msrb.mxu2 %v598_v16  ;;  %735 = vmatpush.msrb.mxu3 %v632_v23 }
  0xfa   : > { %v1689_v36 = vmul.f32 0.70710677, %v1682_v30  ;;  %v537_v1 = vmul.f32 0.5, %v1682_v30 }
  0xfb   : > { %v514_v39 = vpop.f32.mrf.mxu2  ;;  %736 = vmatpush.msrb.mxu3 %v630_v29 }
  0xfc   : > { %v1696_v42 = vand.u32 2147483647, %v1689_v36  ;;  %v515_v43 = vadd.f32 %v514_v39, %v454_v31  ;;  %vm585_vm0 = vcmp.lt.f32.partialorder %v1689_v36, 0.0 }
  0xfd   : > { %v534_v46 = vpop.f32.mrf.mxu3 }
  0xfe   : > { %v543_v49 = vmul.f32 0.3275911, %v1696_v42  ;;  %v1703_v50 = vadd.f32 %v534_v46, %v515_v43  ;;  %v573_v25 = vsub.f32 0.0, %v1696_v42 }
 0x100   : > { %v545_v55 = vadd.f32 1.0, %v543_v49  ;;  %v1710_v56 = vmul.f32 0.70710677, %v1703_v50  ;;  %v575_v33 = vmul.f32 %v573_v25, %v1696_v42 }
 0x102   : > { %1080 = vrcp.f32 %v545_v55  ;;  %v1717_v61 = vand.u32 2147483647, %v1710_v56  ;;  %v577_v40 = vmul.f32 1.442695, %v575_v33  ;;  %vm586_vm1 = vcmp.lt.f32.partialorder %v1710_v56, 0.0 }
 0x104   : > { %v544_v2 = vmul.f32 0.3275911, %v1717_v61  ;;  %v574_v37 = vsub.f32 0.0, %v1717_v61 }
 0x106   : > { %v546_v7 = vadd.f32 1.0, %v544_v2  ;;  %v576_v44 = vmul.f32 %v574_v37, %v1717_v61 }
 0x108   : > { %v1081_v12 = vpop.eup %1080  ;;  %1082 = vrcp.f32 %v546_v7  ;;  %v579_v49 = vmul.f32 1.442695, %v576_v44 }
 0x109   : > { %v549_v15 = vmul.f32 %v1081_v12, %v545_v55  ;;  %1084 = vpow2.f32 %v577_v40 }
 0x10a   : > { %1086 = vpow2.f32 %v579_v49 }
 0x10b   : > { %v551_v18 = vsub.f32 2.0, %v549_v15 }
 0x10d   : > { %v553_v22 = vmul.f32 %v1081_v12, %v551_v18 }
 0x10e   : > { %v1083_v24 = vpop.eup %1082 }
 0x10f   : > { %v550_v27 = vmul.f32 %v1083_v24, %v546_v7  ;;  %v555_v28 = vmul.f32 1.0614054, %v553_v22  ;;  %v1085_v54 = vpop.eup %1084  ;;  %v538_v7 = vmul.f32 0.5, %v1703_v50 }
 0x110   : > { %v1087_v63 = vpop.eup %1086 }
 0x111   : > { %v552_v31 = vsub.f32 2.0, %v550_v27  ;;  %v557_v32 = vadd.f32 -1.4531521, %v555_v28 }
 0x113   : > { %v554_v34 = vmul.f32 %v1083_v24, %v552_v31  ;;  %v559_v35 = vmul.f32 %v557_v32, %v553_v22 }
 0x115   : > { %v561_v38 = vadd.f32 1.4214138, %v559_v35  ;;  %v556_v39 = vmul.f32 1.0614054, %v554_v34 }
 0x117   : > { %v563_v41 = vmul.f32 %v561_v38, %v553_v22  ;;  %v558_v43 = vadd.f32 -1.4531521, %v556_v39 }
 0x119   : > { %v565_v45 = vadd.f32 -0.28449672, %v563_v41  ;;  %v560_v46 = vmul.f32 %v558_v43, %v554_v34 }
 0x11b   : > { %v567_v47 = vmul.f32 %v565_v45, %v553_v22  ;;  %v562_v48 = vadd.f32 1.4214138, %v560_v46 }
 0x11d   : > { %v569_v51 = vadd.f32 0.2548296, %v567_v47  ;;  %v564_v42 = vmul.f32 %v562_v48, %v554_v34 }
 0x11f   : > { %v571_v52 = vmul.f32 %v569_v51, %v553_v22  ;;  %v566_v53 = vadd.f32 -0.28449672, %v564_v42 }
 0x121   : > { %v581_v55 = vmul.f32 %v1085_v54, %v571_v52  ;;  %v568_v57 = vmul.f32 %v566_v53, %v554_v34 }
 0x123   : > { %v583_v58 = vsub.f32 1.0, %v581_v55  ;;  %v570_v59 = vadd.f32 0.2548296, %v568_v57 }
 0x125   : > { %v587_v60 = vsub.f32 0.0, %v583_v58  ;;  %v572_v62 = vmul.f32 %v570_v59, %v554_v34 }
 0x127   : > { %v589_v61 = vsel %vm585_vm0, %v587_v60, %v583_v58  ;;  %v582_v0 = vmul.f32 %v1087_v63, %v572_v62 }
 0x128   : > { %v591_v2 = vadd.f32 1.0, %v589_v61 }
 0x129   : > { %v584_v3 = vsub.f32 1.0, %v582_v0 }
 0x12a   : > { %v593_v4 = vmul.f32 %v591_v2, %v537_v1 }
 0x12b   : > { %v588_v5 = vsub.f32 0.0, %v584_v3 }
 0x12c   : > { %677 = vmatmul.f32.vlgmr.msrb.gmra.mxu0 %v593_v4  ;;  %717 = vmatmul.f32.vlgmr.msrb.gmra.mxu2 %v593_v4 }
 0x12d   : > { %v590_v6 = vsel %vm586_vm1, %v588_v5, %v584_v3 }
 0x12e   : > { %v592_v8 = vadd.f32 1.0, %v590_v6 }
 0x130   : > { %v594_v9 = vmul.f32 %v592_v8, %v538_v7 }
 0x132   : > { %697 = vmatmul.f32.vlgmr.msrb.gmra.mxu1 %v594_v9  ;;  %737 = vmatmul.f32.vlgmr.msrb.gmra.mxu3 %v594_v9 }
 0x1a9   : > { %v678_v36 = vpop.f32.mrf.mxu0 }
 0x1af   : > { %v698_v11 = vpop.f32.mrf.mxu1  ;;  %v718_v13 = vpop.f32.mrf.mxu2 }
 0x1b0   : > { %v699_v12 = vadd.f32 %v698_v11, %v678_v36 }
 0x1b2   : > { %v741_v30 = vadd.f32 %v699_v12, %v595_v10 }
 0x1b4   : > { %743 = vst [vmem:[#allocation2] sm:$0xff] %v741_v30 }
 0x1b5   : > { %v738_v15 = vpop.f32.mrf.mxu3 }
 0x1b6   : > { %v739_v16 = vadd.f32 %v738_v15, %v718_v13  ;;  %748 = sbr.rel (%p948_p4) target bundleno = 453 (0x1c5), region = 64 }
 0x1b8   : > { %v742_v56 = vadd.f32 %v739_v16, %v596_v14 }
 0x1ba   : > { %744 = vst [vmem:[#allocation2 + $0x8] sm:$0xff] %v742_v56 }
 0x1bb   : > { %v749_v50 = vld [vmem:[#allocation2] sm:$0xff] }
 0x1bc   : > { %v751_v17 = vld [vmem:[%s1856_s13] sm:$0x3] }
 0x1bd   : > { %v753_v19 = vperm.slane %v751_v17, 0  ;;  %v754_v20 = vperm.slane %v751_v17, 1 }
 0x1bf   : > { %v757_v21 = vadd.f32 %v753_v19, %v749_v50 }
 0x1c1   : > { %v750_v18 = vld [vmem:[#allocation2 + $0x8] sm:$0xff]  ;;  %759 = vst [vmem:[%s1590_s10] sm:$0xff] %v757_v21 }
 0x1c2   : > { %v758_v22 = vadd.f32 %v754_v20, %v750_v18 }
 0x1c4   : > { %760 = vst [vmem:[%s1590_s10 + $0x8] sm:$0xff] %v758_v22 }
 0x1c5 PF: > { %s1857_s14 = sld [smem:[#allocation19_spill]]  ;;  %s775_s12 = sshll.u32 %s1590_s10, 4  ;;  %s776_s12 = int_to_ptr.vmem [resolvable:$true] %s775_s12 }
 0x1c6   : > { %s1858_s23 = sld [smem:[#allocation30_spill]]  ;;  %s762_s28 = scalar_lea.sflag [#allocation5], %s1564_s0 }
 0x1cb   : > { %s958_s24 = sshll.u32 %s1857_s14, 4 }
 0x1cc   : > { %s1859_s9 = smov %s1858_s23  ;;  %s773_s27 = scalar_lea.hbm %s1858_s23, %s958_s24 }
 0x1cd   : > { %s777_s16 = sshll.u32 %s773_s27, 4  ;;  %s1228_s11 = scalar_lea.hbm %s1859_s9, 32  ;;  %s778_s16 = int_to_ptr.hbm [resolvable:$true] %s777_s16 }
 0x1ce   : > { %s1222_s21 = sshra.s32 %s778_s16, 4  ;;  %s1223_s21 = int_to_ptr.hbm [resolvable:$true] %s1222_s21 }
 0x1cf   : > { %s1224_s6 = scalar_lea.hbm %s1223_s21, 16  ;;  %p1229_p3 = scmp.lt.s32.totalorder %s1223_s21, %s1859_s9 }
 0x1d0   : > { %p1225_p7 = scmp.ne.s32.totalorder %s1223_s21, %s1224_s6  ;;  %p1230_p0 = scmp.lt.s32.totalorder %s1228_s11, %s1224_s6 }
 0x1d2   : > { %p1226_p10 = pnand %p1225_p7, %p1521_p12  ;;  %p1231_p5 = por %p1230_p0, %p1229_p3 }
 0x1d4   : > { %p1227_p11 = pneg %p1226_p10 }
 0x1d6   : > { %p1232_p6 = pnand %p1231_p5, %p1227_p11 }
 0x1d8   : > { %1235 = shalt.err (!%p1232_p6)
}
 0x1d9   : > { %967 = dma.vmem_to_hbm [thread:$0]  (%p1521_p12), %s776_s12, 256, %s778_s16, %s762_s28  }
 0x1da PF: > { %s1860_s0 = sld [smem:[#allocation21_spill]] }
 0x1db   : > { %s1861_s18 = sld [smem:[#allocation17_spill]] }
 0x1e0   : > { %p987_p8 = scmp.ge.s32.totalorder %s1860_s0, 2 }
 0x1e1   : > { %s789_s1 = sand.u32 1, %s1861_s18  }
 0x1e2   : > { %p983_p13 = pnand %p987_p8, %p1530_p1  ;;  %s790_s10 = scalar_lea.sflag [#allocation5], %s789_s1 }
 0x1e4   : > { %p984_p9 = pneg %p983_p13 }
 0x1e6   : > { %1293 = dma.done.wait (%p984_p9), %s790_s10, 256  }
 0x1e7   : > { %1295 = vsyncadd (%p984_p9), %s790_s10, 4294967040  ;;  %s27_s28 = sadd.s32 1, %s1860_s0   ;;  %s1863_s29 = sld [smem:[#allocation16_spill]] }
 0x1e8   : > { %p24_p2 = scmp.ge.s32.totalorder %s27_s28, 6   ;;  %s1864_s20 = sld [smem:[#allocation24_spill]] }
 0x1e9   : > { %s1865_s5 = sld [smem:[#allocation18_spill]]  ;;  %s1870_s18 = smov %s1302_s19 }
 0x1ea   : > { %s1866_s23 = sld [smem:[#allocation25_spill]]  ;;  %s1872_s21 = smov %s1314_s22 }
 0x1eb   : > { %s1867_s25 = sld [smem:[#allocation20_spill]]  ;;  %s1874_s24 = smov %s1330_s26 }
 0x1ec   : > { %s1868_s13 = sld [smem:[#allocation22_spill]] }
 0x1ed   : > { %s1869_s27 = sld [smem:[#allocation23_spill]]  ;;  %s1871_s19 = smov %s1863_s29 }
 0x1ee   :  { %26 = sbr.rel (!%p24_p2) target bundleno = 18 (0x12), region = 130 }
 0x1ef   : > { %s1873_s22 = smov %s1865_s5 }
 0x1f2   : > { %s1875_s26 = smov %s1868_s13 }
 0x1f3   :  { %796 = vsyncpa [#allocation4], 1 }
 0x1f4   :  { %798 = vsyncpa [#allocation4 + $0x1], 1 }
 0x1f5   :  { %799 = vsyncpa [#allocation7], 1 }
 0x1f6   :  { %801 = vsyncpa [#allocation7 + $0x1], 1 }
 0x1f7   :  { %802 = vsyncpa [#allocation10], 1 }
 0x1f8   :  { %804 = vsyncpa [#allocation10 + $0x1], 1 }
 0x1f9   :  { %805 = vsyncpa [#allocation5], 1 }
 0x1fa   :  { %807 = vsyncpa [#allocation5 + $0x1], 1 }

</bundles_post_ra>
